<compile_context>
chip_gen: v7x
topology: tpu7x:2x2x1
jax: 0.10.0
libtpu: 0.0.40
codegen_flags: <defaults>
</compile_context>

<pallas_src>
import jax
import jax.numpy as jnp
from jax import lax
from jax.experimental import pallas as pl
from jax.experimental.pallas import tpu as pltpu


def _next_word_kernel(tok_ref, w1e_ref, b1_ref, w2_ref, b2_ref,
                      w3_ref, b3_ref, w4_ref, b4_ref, out_ref):
    tm, block_size = tok_ref.shape
    _, vocab, h1_dim = w1e_ref.shape

    tok = tok_ref[...]                                   # [TM, block_size] i32
    iota_v = lax.broadcasted_iota(jnp.int32, (tm, vocab), 1)

    # Fused embedding-gather + lin_1: exact one-hot row selection of the
    # pre-folded [vocab, h1] table per position, accumulated in f32 on the MXU.
    h = jnp.zeros((tm, h1_dim), jnp.float32)
    for t in range(block_size):                          # static unroll
        onehot = (tok[:, t:t + 1] == iota_v).astype(jnp.bfloat16)
        h = h + jnp.dot(onehot, w1e_ref[t],
                        preferred_element_type=jnp.float32)
    h = jnp.maximum(h + b1_ref[...], 0.0)                # lin_1 + ReLU

    def dense(x, w_ref, b_ref, relu):
        y = jnp.dot(x.astype(jnp.bfloat16), w_ref[...],
                    preferred_element_type=jnp.float32) + b_ref[...]
        return jnp.maximum(y, 0.0) if relu else y

    h = dense(h, w2_ref, b2_ref, True)                   # lin_2 + ReLU
    h = dense(h, w3_ref, b3_ref, True)                   # lin_3 + ReLU
    h = dense(h, w4_ref, b4_ref, False)                  # lin_4 (no activation)
    out_ref[...] = h.astype(out_ref.dtype)


def _round_up(a, m):
    return ((a + m - 1) // m) * m


def _fold_embedding(emb_table, w1, block_size, emb_dim):
    """W1eff[t] = emb_table @ w1[t*emb_dim:(t+1)*emb_dim, :], folded in f32."""
    h1 = w1.shape[1]
    w1_resh = w1.reshape(block_size, emb_dim, h1)
    return jnp.einsum('ve,teh->tvh', emb_table.astype(jnp.float32),
                      w1_resh.astype(jnp.float32))        # [bs, vocab, h1] f32


def next_word_forward(tokens, emb_table, params, *, tm=512,
                      out_dtype=jnp.float32):
    """tokens: [B, block_size] int32; returns logits [B, vocab_size]."""
    B, block_size = tokens.shape
    vocab_size, emb_dim = emb_table.shape
    (w1, b1), (w2, b2), (w3, b3), (w4, b4) = params
    h1d, h2d, h3d = w1.shape[1], w2.shape[1], w3.shape[1]
    assert w1.shape[0] == block_size * emb_dim
    assert w4.shape[1] == vocab_size

    # Fold embedding into lin_1 in f32, then cast everything for the MXU.
    w1eff = _fold_embedding(emb_table, w1, block_size, emb_dim)
    w1e_bf = w1eff.astype(jnp.bfloat16)                   # [bs, vocab, h1]
    w2b, w3b, w4b = (w.astype(jnp.bfloat16) for w in (w2, w3, w4))

    # Batch tiling: big tiles to amortize per-step overhead, but keep >= 2
    # grid steps when the batch allows it so v7x's two TCs both get work.
    b8 = _round_up(B, 8)
    tm = max(8, min(tm, b8))
    if b8 >= 16:
        tm = min(tm, _round_up(pl.cdiv(b8, 2), 8))
    b_pad = _round_up(B, tm)
    tok_pad = jnp.pad(tokens, ((0, b_pad - B), (0, 0)))   # pad rows -> sliced off
    grid = (b_pad // tm,)

    flops = 2 * b_pad * (block_size * vocab_size * h1d    # fused gather+lin_1
                         + h1d * h2d + h2d * h3d + h3d * vocab_size)
    bytes_accessed = (tok_pad.size * 4 + w1e_bf.size * 2
                      + sum(w.size * 2 for w in (w2b, w3b, w4b))
                      + sum(b.size * 4 for b in (b1, b2, b3, b4))
                      + b_pad * vocab_size * jnp.dtype(out_dtype).itemsize)
    cost = pl.CostEstimate(flops=flops, transcendentals=0,
                           bytes_accessed=bytes_accessed)

    def resident(a):
        # Constant index map: block never changes -> stays VMEM-resident.
        return pl.BlockSpec(a.shape, lambda i: (0,) * a.ndim)

    out = pl.pallas_call(
        _next_word_kernel,
        out_shape=jax.ShapeDtypeStruct((b_pad, vocab_size), out_dtype),
        grid=grid,
        in_specs=[
            pl.BlockSpec((tm, block_size), lambda i: (i, 0)),   # token tile
            resident(w1e_bf), resident(b1),
            resident(w2b), resident(b2),
            resident(w3b), resident(b3),
            resident(w4b), resident(b4),
        ],
        out_specs=pl.BlockSpec((tm, vocab_size), lambda i: (i, 0)),
        compiler_params=pltpu.CompilerParams(
            dimension_semantics=("parallel",)),
        cost_estimate=cost,
    )(tok_pad, w1e_bf, b1, w2b, b2, w3b, b3, w4b, b4)
    return out[:B]


def init_params(key, block_size, vocab_size, emb_dim, hidden_size):
    """Deterministic synthetic init matching the PyTorch module's shapes.

    Linear weights are stored already transposed to [in, out]; biases [1, out].
    """
    dims_in = [block_size * emb_dim, hidden_size[0], hidden_size[1], hidden_size[2]]
    dims_out = [hidden_size[0], hidden_size[1], hidden_size[2], vocab_size]

    keys = jax.random.split(key, 1 + 2 * len(dims_in))
    emb_table = jax.random.normal(keys[0], (vocab_size, emb_dim), jnp.float32)

    params = []
    for i, (din, dout) in enumerate(zip(dims_in, dims_out)):
        bound = 1.0 / jnp.sqrt(din)
        w = jax.random.uniform(keys[1 + 2 * i], (din, dout), jnp.float32,
                               minval=-bound, maxval=bound)
        b = jax.random.uniform(keys[2 + 2 * i], (1, dout), jnp.float32,
                               minval=-bound, maxval=bound)
        params.append((w, b))
    return emb_table, params


if __name__ == "__main__":
    # Small, lane-friendly config consistent with the module's forward.
    block_size = 8
    vocab_size = 256
    emb_dim = 16
    hidden_size = [128, 128, 128]
    batch = 12          # deliberately not a multiple of the batch tile

    key = jax.random.PRNGKey(0)
    k_params, k_tok = jax.random.split(key)
    emb_table, params = init_params(k_params, block_size, vocab_size,
                                    emb_dim, hidden_size)
    tokens = jax.random.randint(k_tok, (batch, block_size), 0, vocab_size,
                                dtype=jnp.int32)

    # Default tm=512 clamps down to 8 here -> grid=(2,), exercising the
    # multi-step grid, VMEM-resident folded weights, and batch padding path.
    logits = next_word_forward(tokens, emb_table, params)
    jax.block_until_ready(logits)

    # Reference matching the kernel's numerics: folded-then-bf16 first layer
    # (exact row selection, f32 accumulation), bf16-in / f32-acc later layers.
    w1eff_bf = _fold_embedding(emb_table, params[0][0], block_size,
                               emb_dim).astype(jnp.bfloat16)
    ref = jnp.zeros((batch, hidden_size[0]), jnp.float32)
    for t in range(block_size):
        ref = ref + w1eff_bf[t][tokens[:, t]].astype(jnp.float32)
    ref = jnp.maximum(ref + params[0][1], 0.0)
    for i, (w, b) in enumerate(params[1:], start=2):
        ref = jnp.dot(ref.astype(jnp.bfloat16), w.astype(jnp.bfloat16),
                      preferred_element_type=jnp.float32) + b
        if i < 4:
            ref = jnp.maximum(ref, 0.0)

    assert logits.shape == (batch, vocab_size)
    assert jnp.allclose(logits, ref, atol=1e-3, rtol=1e-3)

    # Sanity against the pure-f32 original-module math (looser: bf16 fold).
    x_f32 = emb_table[tokens].reshape(batch, -1)
    full = x_f32
    for i, (w, b) in enumerate(params):
        full = full @ w + b
        if i < 3:
            full = jnp.maximum(full, 0.0)
    assert jnp.allclose(logits, full, atol=5e-2, rtol=5e-2)

    print("KERNEL_OK")
</pallas_src>

<mosaic_0001>
module attributes {stable_mosaic.version = 11 : i64} {
  func.func @_next_word_kernel(%arg0: i32, %arg1: memref<8x8xi32, #tpu.memory_space<vmem>>, %arg2: memref<8x256x128xbf16, #tpu.memory_space<vmem>>, %arg3: memref<1x128xf32, #tpu.memory_space<vmem>>, %arg4: memref<128x128xbf16, #tpu.memory_space<vmem>>, %arg5: memref<1x128xf32, #tpu.memory_space<vmem>>, %arg6: memref<128x128xbf16, #tpu.memory_space<vmem>>, %arg7: memref<1x128xf32, #tpu.memory_space<vmem>>, %arg8: memref<128x256xbf16, #tpu.memory_space<vmem>>, %arg9: memref<1x256xf32, #tpu.memory_space<vmem>>, %arg10: memref<8x256xf32, #tpu.memory_space<vmem>>) attributes {dimension_semantics = [#tpu.dimension_semantics<parallel>], iteration_bounds = array<i64: 2>, scalar_prefetch = 0 : i64, scratch_operands = 0 : i64, tpu.core_type = #tpu.core_type<tc>, window_params = [{transform_indices = @transform_0, window_bounds = array<i64: 8, 8>}, {pipeline_mode = #tpu.pipeline_mode<synchronous>, transform_indices = @transform_1, window_bounds = array<i64: 8, 256, 128>}, {pipeline_mode = #tpu.pipeline_mode<synchronous>, transform_indices = @transform_2, window_bounds = array<i64: 1, 128>}, {pipeline_mode = #tpu.pipeline_mode<synchronous>, transform_indices = @transform_3, window_bounds = array<i64: 128, 128>}, {pipeline_mode = #tpu.pipeline_mode<synchronous>, transform_indices = @transform_4, window_bounds = array<i64: 1, 128>}, {pipeline_mode = #tpu.pipeline_mode<synchronous>, transform_indices = @transform_5, window_bounds = array<i64: 128, 128>}, {pipeline_mode = #tpu.pipeline_mode<synchronous>, transform_indices = @transform_6, window_bounds = array<i64: 1, 128>}, {pipeline_mode = #tpu.pipeline_mode<synchronous>, transform_indices = @transform_7, window_bounds = array<i64: 128, 256>}, {pipeline_mode = #tpu.pipeline_mode<synchronous>, transform_indices = @transform_8, window_bounds = array<i64: 1, 256>}, {transform_indices = @transform_9, window_bounds = array<i64: 8, 256>}]} {
    %c0 = arith.constant 0 : index
    %c0_0 = arith.constant 0 : index
    %0 = vector.load %arg1[%c0, %c0_0] : memref<8x8xi32, #tpu.memory_space<vmem>>, vector<8x8xi32>
    %1 = tpu.iota {dimensions = array<i32: 1>} : vector<8x256xi32>
    %cst = arith.constant 0.000000e+00 : f32
    %2 = vector.broadcast %cst : f32 to vector<8x128xf32>
    %3 = vector.extract_strided_slice %0 {offsets = [0, 0], sizes = [8, 1], strides = [1, 1]} : vector<8x8xi32> to vector<8x1xi32>
    %4 = vector.broadcast %3 : vector<8x1xi32> to vector<8x256xi32>
    %5 = arith.cmpi eq, %4, %1 : vector<8x256xi32>
    %6 = arith.extui %5 : vector<8x256xi1> to vector<8x256xi32>
    %7 = arith.sitofp %6 : vector<8x256xi32> to vector<8x256xf32>
    %8 = arith.truncf %7 : vector<8x256xf32> to vector<8x256xbf16>
    %c0_1 = arith.constant 0 : index
    %c0_2 = arith.constant 0 : index
    %c0_3 = arith.constant 0 : index
    %9 = vector.load %arg2[%c0_1, %c0_2, %c0_3] : memref<8x256x128xbf16, #tpu.memory_space<vmem>>, vector<1x256x128xbf16>
    %10 = vector.shape_cast %9 : vector<1x256x128xbf16> to vector<256x128xbf16>
    %cst_4 = arith.constant dense<0.000000e+00> : vector<8x128xf32>
    %11 = tpu.matmul %8, %10, %cst_4 {dimension_numbers = #tpu.dot_dimension_numbers<[1], [0], [0], [1], [0, 0, 1, 1], [], []>} : vector<8x256xbf16>, vector<256x128xbf16>, vector<8x128xf32> -> vector<8x128xf32>
    %12 = arith.addf %2, %11 : vector<8x128xf32>
    %13 = vector.extract_strided_slice %0 {offsets = [0, 1], sizes = [8, 1], strides = [1, 1]} : vector<8x8xi32> to vector<8x1xi32>
    %14 = vector.broadcast %13 : vector<8x1xi32> to vector<8x256xi32>
    %15 = arith.cmpi eq, %14, %1 : vector<8x256xi32>
    %16 = arith.extui %15 : vector<8x256xi1> to vector<8x256xi32>
    %17 = arith.sitofp %16 : vector<8x256xi32> to vector<8x256xf32>
    %18 = arith.truncf %17 : vector<8x256xf32> to vector<8x256xbf16>
    %c1 = arith.constant 1 : index
    %c0_5 = arith.constant 0 : index
    %c0_6 = arith.constant 0 : index
    %19 = vector.load %arg2[%c1, %c0_5, %c0_6] : memref<8x256x128xbf16, #tpu.memory_space<vmem>>, vector<1x256x128xbf16>
    %20 = vector.shape_cast %19 : vector<1x256x128xbf16> to vector<256x128xbf16>
    %cst_7 = arith.constant dense<0.000000e+00> : vector<8x128xf32>
    %21 = tpu.matmul %18, %20, %cst_7 {dimension_numbers = #tpu.dot_dimension_numbers<[1], [0], [0], [1], [0, 0, 1, 1], [], []>} : vector<8x256xbf16>, vector<256x128xbf16>, vector<8x128xf32> -> vector<8x128xf32>
    %22 = arith.addf %12, %21 : vector<8x128xf32>
    %23 = vector.extract_strided_slice %0 {offsets = [0, 2], sizes = [8, 1], strides = [1, 1]} : vector<8x8xi32> to vector<8x1xi32>
    %24 = vector.broadcast %23 : vector<8x1xi32> to vector<8x256xi32>
    %25 = arith.cmpi eq, %24, %1 : vector<8x256xi32>
    %26 = arith.extui %25 : vector<8x256xi1> to vector<8x256xi32>
    %27 = arith.sitofp %26 : vector<8x256xi32> to vector<8x256xf32>
    %28 = arith.truncf %27 : vector<8x256xf32> to vector<8x256xbf16>
    %c2 = arith.constant 2 : index
    %c0_8 = arith.constant 0 : index
    %c0_9 = arith.constant 0 : index
    %29 = vector.load %arg2[%c2, %c0_8, %c0_9] : memref<8x256x128xbf16, #tpu.memory_space<vmem>>, vector<1x256x128xbf16>
    %30 = vector.shape_cast %29 : vector<1x256x128xbf16> to vector<256x128xbf16>
    %cst_10 = arith.constant dense<0.000000e+00> : vector<8x128xf32>
    %31 = tpu.matmul %28, %30, %cst_10 {dimension_numbers = #tpu.dot_dimension_numbers<[1], [0], [0], [1], [0, 0, 1, 1], [], []>} : vector<8x256xbf16>, vector<256x128xbf16>, vector<8x128xf32> -> vector<8x128xf32>
    %32 = arith.addf %22, %31 : vector<8x128xf32>
    %33 = vector.extract_strided_slice %0 {offsets = [0, 3], sizes = [8, 1], strides = [1, 1]} : vector<8x8xi32> to vector<8x1xi32>
    %34 = vector.broadcast %33 : vector<8x1xi32> to vector<8x256xi32>
    %35 = arith.cmpi eq, %34, %1 : vector<8x256xi32>
    %36 = arith.extui %35 : vector<8x256xi1> to vector<8x256xi32>
    %37 = arith.sitofp %36 : vector<8x256xi32> to vector<8x256xf32>
    %38 = arith.truncf %37 : vector<8x256xf32> to vector<8x256xbf16>
    %c3 = arith.constant 3 : index
    %c0_11 = arith.constant 0 : index
    %c0_12 = arith.constant 0 : index
    %39 = vector.load %arg2[%c3, %c0_11, %c0_12] : memref<8x256x128xbf16, #tpu.memory_space<vmem>>, vector<1x256x128xbf16>
    %40 = vector.shape_cast %39 : vector<1x256x128xbf16> to vector<256x128xbf16>
    %cst_13 = arith.constant dense<0.000000e+00> : vector<8x128xf32>
    %41 = tpu.matmul %38, %40, %cst_13 {dimension_numbers = #tpu.dot_dimension_numbers<[1], [0], [0], [1], [0, 0, 1, 1], [], []>} : vector<8x256xbf16>, vector<256x128xbf16>, vector<8x128xf32> -> vector<8x128xf32>
    %42 = arith.addf %32, %41 : vector<8x128xf32>
    %43 = vector.extract_strided_slice %0 {offsets = [0, 4], sizes = [8, 1], strides = [1, 1]} : vector<8x8xi32> to vector<8x1xi32>
    %44 = vector.broadcast %43 : vector<8x1xi32> to vector<8x256xi32>
    %45 = arith.cmpi eq, %44, %1 : vector<8x256xi32>
    %46 = arith.extui %45 : vector<8x256xi1> to vector<8x256xi32>
    %47 = arith.sitofp %46 : vector<8x256xi32> to vector<8x256xf32>
    %48 = arith.truncf %47 : vector<8x256xf32> to vector<8x256xbf16>
    %c4 = arith.constant 4 : index
    %c0_14 = arith.constant 0 : index
    %c0_15 = arith.constant 0 : index
    %49 = vector.load %arg2[%c4, %c0_14, %c0_15] : memref<8x256x128xbf16, #tpu.memory_space<vmem>>, vector<1x256x128xbf16>
    %50 = vector.shape_cast %49 : vector<1x256x128xbf16> to vector<256x128xbf16>
    %cst_16 = arith.constant dense<0.000000e+00> : vector<8x128xf32>
    %51 = tpu.matmul %48, %50, %cst_16 {dimension_numbers = #tpu.dot_dimension_numbers<[1], [0], [0], [1], [0, 0, 1, 1], [], []>} : vector<8x256xbf16>, vector<256x128xbf16>, vector<8x128xf32> -> vector<8x128xf32>
    %52 = arith.addf %42, %51 : vector<8x128xf32>
    %53 = vector.extract_strided_slice %0 {offsets = [0, 5], sizes = [8, 1], strides = [1, 1]} : vector<8x8xi32> to vector<8x1xi32>
    %54 = vector.broadcast %53 : vector<8x1xi32> to vector<8x256xi32>
    %55 = arith.cmpi eq, %54, %1 : vector<8x256xi32>
    %56 = arith.extui %55 : vector<8x256xi1> to vector<8x256xi32>
    %57 = arith.sitofp %56 : vector<8x256xi32> to vector<8x256xf32>
    %58 = arith.truncf %57 : vector<8x256xf32> to vector<8x256xbf16>
    %c5 = arith.constant 5 : index
    %c0_17 = arith.constant 0 : index
    %c0_18 = arith.constant 0 : index
    %59 = vector.load %arg2[%c5, %c0_17, %c0_18] : memref<8x256x128xbf16, #tpu.memory_space<vmem>>, vector<1x256x128xbf16>
    %60 = vector.shape_cast %59 : vector<1x256x128xbf16> to vector<256x128xbf16>
    %cst_19 = arith.constant dense<0.000000e+00> : vector<8x128xf32>
    %61 = tpu.matmul %58, %60, %cst_19 {dimension_numbers = #tpu.dot_dimension_numbers<[1], [0], [0], [1], [0, 0, 1, 1], [], []>} : vector<8x256xbf16>, vector<256x128xbf16>, vector<8x128xf32> -> vector<8x128xf32>
    %62 = arith.addf %52, %61 : vector<8x128xf32>
    %63 = vector.extract_strided_slice %0 {offsets = [0, 6], sizes = [8, 1], strides = [1, 1]} : vector<8x8xi32> to vector<8x1xi32>
    %64 = vector.broadcast %63 : vector<8x1xi32> to vector<8x256xi32>
    %65 = arith.cmpi eq, %64, %1 : vector<8x256xi32>
    %66 = arith.extui %65 : vector<8x256xi1> to vector<8x256xi32>
    %67 = arith.sitofp %66 : vector<8x256xi32> to vector<8x256xf32>
    %68 = arith.truncf %67 : vector<8x256xf32> to vector<8x256xbf16>
    %c6 = arith.constant 6 : index
    %c0_20 = arith.constant 0 : index
    %c0_21 = arith.constant 0 : index
    %69 = vector.load %arg2[%c6, %c0_20, %c0_21] : memref<8x256x128xbf16, #tpu.memory_space<vmem>>, vector<1x256x128xbf16>
    %70 = vector.shape_cast %69 : vector<1x256x128xbf16> to vector<256x128xbf16>
    %cst_22 = arith.constant dense<0.000000e+00> : vector<8x128xf32>
    %71 = tpu.matmul %68, %70, %cst_22 {dimension_numbers = #tpu.dot_dimension_numbers<[1], [0], [0], [1], [0, 0, 1, 1], [], []>} : vector<8x256xbf16>, vector<256x128xbf16>, vector<8x128xf32> -> vector<8x128xf32>
    %72 = arith.addf %62, %71 : vector<8x128xf32>
    %73 = vector.extract_strided_slice %0 {offsets = [0, 7], sizes = [8, 1], strides = [1, 1]} : vector<8x8xi32> to vector<8x1xi32>
    %74 = vector.broadcast %73 : vector<8x1xi32> to vector<8x256xi32>
    %75 = arith.cmpi eq, %74, %1 : vector<8x256xi32>
    %76 = arith.extui %75 : vector<8x256xi1> to vector<8x256xi32>
    %77 = arith.sitofp %76 : vector<8x256xi32> to vector<8x256xf32>
    %78 = arith.truncf %77 : vector<8x256xf32> to vector<8x256xbf16>
    %c7 = arith.constant 7 : index
    %c0_23 = arith.constant 0 : index
    %c0_24 = arith.constant 0 : index
    %79 = vector.load %arg2[%c7, %c0_23, %c0_24] : memref<8x256x128xbf16, #tpu.memory_space<vmem>>, vector<1x256x128xbf16>
    %80 = vector.shape_cast %79 : vector<1x256x128xbf16> to vector<256x128xbf16>
    %cst_25 = arith.constant dense<0.000000e+00> : vector<8x128xf32>
    %81 = tpu.matmul %78, %80, %cst_25 {dimension_numbers = #tpu.dot_dimension_numbers<[1], [0], [0], [1], [0, 0, 1, 1], [], []>} : vector<8x256xbf16>, vector<256x128xbf16>, vector<8x128xf32> -> vector<8x128xf32>
    %82 = arith.addf %72, %81 : vector<8x128xf32>
    %c0_26 = arith.constant 0 : index
    %c0_27 = arith.constant 0 : index
    %83 = vector.load %arg3[%c0_26, %c0_27] : memref<1x128xf32, #tpu.memory_space<vmem>>, vector<1x128xf32>
    %84 = vector.broadcast %83 : vector<1x128xf32> to vector<8x128xf32>
    %85 = arith.addf %82, %84 : vector<8x128xf32>
    %cst_28 = arith.constant 0.000000e+00 : f32
    %86 = vector.broadcast %cst_28 : f32 to vector<8x128xf32>
    %87 = arith.maximumf %85, %86 : vector<8x128xf32>
    %88 = arith.truncf %87 : vector<8x128xf32> to vector<8x128xbf16>
    %c0_29 = arith.constant 0 : index
    %c0_30 = arith.constant 0 : index
    %89 = vector.load %arg4[%c0_29, %c0_30] : memref<128x128xbf16, #tpu.memory_space<vmem>>, vector<128x128xbf16>
    %cst_31 = arith.constant dense<0.000000e+00> : vector<8x128xf32>
    %90 = tpu.matmul %88, %89, %cst_31 {dimension_numbers = #tpu.dot_dimension_numbers<[1], [0], [0], [1], [0, 0, 1, 1], [], []>} : vector<8x128xbf16>, vector<128x128xbf16>, vector<8x128xf32> -> vector<8x128xf32>
    %c0_32 = arith.constant 0 : index
    %c0_33 = arith.constant 0 : index
    %91 = vector.load %arg5[%c0_32, %c0_33] : memref<1x128xf32, #tpu.memory_space<vmem>>, vector<1x128xf32>
    %92 = vector.broadcast %91 : vector<1x128xf32> to vector<8x128xf32>
    %93 = arith.addf %90, %92 : vector<8x128xf32>
    %cst_34 = arith.constant 0.000000e+00 : f32
    %94 = vector.broadcast %cst_34 : f32 to vector<8x128xf32>
    %95 = arith.maximumf %93, %94 : vector<8x128xf32>
    %96 = arith.truncf %95 : vector<8x128xf32> to vector<8x128xbf16>
    %c0_35 = arith.constant 0 : index
    %c0_36 = arith.constant 0 : index
    %97 = vector.load %arg6[%c0_35, %c0_36] : memref<128x128xbf16, #tpu.memory_space<vmem>>, vector<128x128xbf16>
    %cst_37 = arith.constant dense<0.000000e+00> : vector<8x128xf32>
    %98 = tpu.matmul %96, %97, %cst_37 {dimension_numbers = #tpu.dot_dimension_numbers<[1], [0], [0], [1], [0, 0, 1, 1], [], []>} : vector<8x128xbf16>, vector<128x128xbf16>, vector<8x128xf32> -> vector<8x128xf32>
    %c0_38 = arith.constant 0 : index
    %c0_39 = arith.constant 0 : index
    %99 = vector.load %arg7[%c0_38, %c0_39] : memref<1x128xf32, #tpu.memory_space<vmem>>, vector<1x128xf32>
    %100 = vector.broadcast %99 : vector<1x128xf32> to vector<8x128xf32>
    %101 = arith.addf %98, %100 : vector<8x128xf32>
    %cst_40 = arith.constant 0.000000e+00 : f32
    %102 = vector.broadcast %cst_40 : f32 to vector<8x128xf32>
    %103 = arith.maximumf %101, %102 : vector<8x128xf32>
    %104 = arith.truncf %103 : vector<8x128xf32> to vector<8x128xbf16>
    %c0_41 = arith.constant 0 : index
    %c0_42 = arith.constant 0 : index
    %105 = vector.load %arg8[%c0_41, %c0_42] : memref<128x256xbf16, #tpu.memory_space<vmem>>, vector<128x256xbf16>
    %cst_43 = arith.constant dense<0.000000e+00> : vector<8x256xf32>
    %106 = tpu.matmul %104, %105, %cst_43 {dimension_numbers = #tpu.dot_dimension_numbers<[1], [0], [0], [1], [0, 0, 1, 1], [], []>} : vector<8x128xbf16>, vector<128x256xbf16>, vector<8x256xf32> -> vector<8x256xf32>
    %c0_44 = arith.constant 0 : index
    %c0_45 = arith.constant 0 : index
    %107 = vector.load %arg9[%c0_44, %c0_45] : memref<1x256xf32, #tpu.memory_space<vmem>>, vector<1x256xf32>
    %108 = vector.broadcast %107 : vector<1x256xf32> to vector<8x256xf32>
    %109 = arith.addf %106, %108 : vector<8x256xf32>
    %c0_46 = arith.constant 0 : index
    %c0_47 = arith.constant 0 : index
    %110 = vector.load %arg10[%c0_46, %c0_47] : memref<8x256xf32, #tpu.memory_space<vmem>>, vector<8x256xf32>
    tpu.vector_store %arg10[%c0_46, %c0_47], %109 {strides = array<i32>} : memref<8x256xf32, #tpu.memory_space<vmem>>, vector<8x256xf32>,
    return
  }
  func.func @transform_0(%arg0: i32) -> (i32, i32) {
    %c0_i32 = arith.constant 0 : i32
    %c0_i32_0 = arith.constant 0 : i32
    return %arg0, %c0_i32 : i32, i32
  }
  func.func @transform_1(%arg0: i32) -> (i32, i32, i32) {
    %c0_i32 = arith.constant 0 : i32
    %c0_i32_0 = arith.constant 0 : i32
    %c0_i32_1 = arith.constant 0 : i32
    %c0_i32_2 = arith.constant 0 : i32
    return %c0_i32, %c0_i32_0, %c0_i32_1 : i32, i32, i32
  }
  func.func @transform_2(%arg0: i32) -> (i32, i32) {
    %c0_i32 = arith.constant 0 : i32
    %c0_i32_0 = arith.constant 0 : i32
    %c0_i32_1 = arith.constant 0 : i32
    return %c0_i32, %c0_i32_0 : i32, i32
  }
  func.func @transform_3(%arg0: i32) -> (i32, i32) {
    %c0_i32 = arith.constant 0 : i32
    %c0_i32_0 = arith.constant 0 : i32
    %c0_i32_1 = arith.constant 0 : i32
    return %c0_i32, %c0_i32_0 : i32, i32
  }
  func.func @transform_4(%arg0: i32) -> (i32, i32) {
    %c0_i32 = arith.constant 0 : i32
    %c0_i32_0 = arith.constant 0 : i32
    %c0_i32_1 = arith.constant 0 : i32
    return %c0_i32, %c0_i32_0 : i32, i32
  }
  func.func @transform_5(%arg0: i32) -> (i32, i32) {
    %c0_i32 = arith.constant 0 : i32
    %c0_i32_0 = arith.constant 0 : i32
    %c0_i32_1 = arith.constant 0 : i32
    return %c0_i32, %c0_i32_0 : i32, i32
  }
  func.func @transform_6(%arg0: i32) -> (i32, i32) {
    %c0_i32 = arith.constant 0 : i32
    %c0_i32_0 = arith.constant 0 : i32
    %c0_i32_1 = arith.constant 0 : i32
    return %c0_i32, %c0_i32_0 : i32, i32
  }
  func.func @transform_7(%arg0: i32) -> (i32, i32) {
    %c0_i32 = arith.constant 0 : i32
    %c0_i32_0 = arith.constant 0 : i32
    %c0_i32_1 = arith.constant 0 : i32
    return %c0_i32, %c0_i32_0 : i32, i32
  }
  func.func @transform_8(%arg0: i32) -> (i32, i32) {
    %c0_i32 = arith.constant 0 : i32
    %c0_i32_0 = arith.constant 0 : i32
    %c0_i32_1 = arith.constant 0 : i32
    return %c0_i32, %c0_i32_0 : i32, i32
  }
  func.func @transform_9(%arg0: i32) -> (i32, i32) {
    %c0_i32 = arith.constant 0 : i32
    %c0_i32_0 = arith.constant 0 : i32
    return %arg0, %c0_i32 : i32, i32
  }
}

</mosaic_0001>

<bundles_post_ra>
// kernel: tpu_custom_call.1
= control target key start
LH: loop header
LB: loop body
LE: loop exit
PB: predicated region body
PF: predicated region fallthrough
CT: control target
= control target key end

     0   :  { %14 = vsyncpa [#allocation3], 0  ;;  %s3660_s0 = inlined_call_operand.vmem [shape: s32[16,8], index: 0, kind: input, shape index: {}]   ;;  %s3661_s1 = inlined_call_operand.hbm [shape: bf16[8,256,128], index: 1, kind: input, shape index: {}]   ;;  %s3662_s2 = inlined_call_operand.vmem [shape: f32[1,128], index: 2, kind: input, shape index: {}]   ;;  %s3663_s3 = inlined_call_operand.hbm [shape: bf16[128,128], index: 3, kind: input, shape index: {}]   ;;  %s3664_s4 = inlined_call_operand.vmem [shape: f32[1,128], index: 4, kind: input, shape index: {}]   ;;  %s3665_s5 = inlined_call_operand.hbm [shape: bf16[128,128], index: 5, kind: input, shape index: {}]   ;;  %s3666_s6 = inlined_call_operand.vmem [shape: f32[1,128], index: 6, kind: input, shape index: {}]   ;;  %s3667_s7 = inlined_call_operand.hbm [shape: bf16[128,256], index: 7, kind: input, shape index: {}]   ;;  %s3668_s8 = inlined_call_operand.vmem [shape: f32[1,256], index: 8, kind: input, shape index: {}]   ;;  %s3669_s9 = inlined_call_operand.hbm [shape: f32[16,256], index: 9, kind: output, shape index: {}]  }
   0x1   :  { %15 = vsyncpa [#allocation6], 0 }
   0x2   :  { %16 = vsyncpa [#allocation9], 0 }
   0x3   :  { %17 = vsyncpa [#allocation4], 0 }
   0x4   :  { %19 = vsyncpa [#allocation4 + $0x1], 0  ;;  %s3334_s30 = smov 0   ;;  %s3336_s10 = smov 0  }
   0x5   :  { %s3338_s11 = smov 0   ;;  %s3340_s12 = smov 0  }
   0x6 LB: > { %3678 = sst [smem:[#allocation15_spill]] %s3250_s30  ;;  %s3355_s13 = sadd.s32 4294967295, %s3262_s12   ;;  %s3262_s12 = sphi %s3340_s12, %s3699_s12   ;;  %s3258_s11 = sphi %s3338_s11, %s3701_s11   ;;  %s3254_s10 = sphi %s3336_s10, %s3703_s10   ;;  %s3250_s30 = sphi %s3334_s30, %s3702_s30  }
   0x7   : > { %3679 = sst [smem:[#allocation16_spill]] %s3258_s11  ;;  %s2339_s14 = sadd.s32 4294967294, %s3262_s12  }
   0x8   : > { %s3359_s15 = sadd.s32 1, %s3262_s12   ;;  %s226_s16 = sadd.s32 1, %s3258_s11 }
   0x9   : > { %3680 = sst [smem:[#allocation17_spill]] %s3359_s15  ;;  %s223_s17 = ssub.s32 %s3262_s12, %s3359_s15 }
   0xa   : > { %p236_p0 = scmp.ne.s32.totalorder %s3258_s11, %s3254_s10  ;;  %p224_p1 = scmp.eq.s32.totalorder %s223_s17, 0 }
   0xb   : > { %p237_p2 = scmp.eq.s32.totalorder %s3355_s13, 1  ;;  %p242_p3 = scmp.ne.s32.totalorder %s3254_s10, %s3250_s30 }
   0xc   : > { %p243_p4 = scmp.eq.s32.totalorder %s2339_s14, 1  ;;  %p2340_p7 = scmp.ge.s32.totalorder %s3262_s12, 1 }
   0xd   : > { %s3370_s18 = scalar_select %p224_p1, %s3258_s11, %s226_s16  }
   0xe   : > { %p3372_p5 = por %p237_p2, %p236_p0  ;;  %p3376_p6 = por %p243_p4, %p242_p3 }
   0xf   : > { %3681 = sst [smem:[#allocation18_spill]] %s3370_s18  ;;  %p250_p8 = scmp.lt.s32.totalorder %s3262_s12, 3 }
  0x10   : > { %s3682_s19 = scalar_select %p3372_p5, 1, 0 }
  0x11   : > { %s3683_s20 = scalar_select %p3376_p6, 1, 0 }
  0x12   : > { %p3670_p9 = scmp.eq.s32.totalorder %s3355_s13, 0  ;;  %p3383_p10 = pnand %p2340_p7, %p250_p8 }
  0x13   : > { %3684 = sst [smem:[#allocation19_spill]] %s3683_s20  ;;  %s3264_s22 = smov [#allocation5]  }
  0x14   : > { %s3685_s21 = scalar_select %p3383_p10, 1, 0 }
  0x15   : > { %p2822_p11 = pneg %p3383_p10  ;;  %s278_s23 = sshll.u32 %s3264_s22, 4  ;;  %s3389_s23 = int_to_ptr.vmem [resolvable:$true] %s278_s23 }
  0x16   : > { %s3265_s25 = smov [#allocation2]   ;;  %s3266_s27 = smov [#allocation7]  }
  0x17   : > { %p3393_p12 = pnand %p3670_p9, %p2822_p11  ;;  %s262_s26 = sshll.u32 %s3265_s25, 4  ;;  %s3397_s26 = int_to_ptr.vmem [resolvable:$true] %s262_s26 }
  0x18   : > { %s3399_s28 = sshll.u32 %s3266_s27, 4  ;;  %s3076_s16 = scalar_lea.hbm %s3663_s3, 1024  ;;  %s295_s28 = int_to_ptr.vmem [resolvable:$true] %s3399_s28 }
  0x19   : > { %p3077_p13 = scmp.ne.s32.totalorder %s3663_s3, %s3076_s16  ;;  %p3409_p0 = pneg %p3393_p12 }
  0x1a   : > { %p3083_p3 = scmp.lt.u32.totalorder %s3076_s16, %s3663_s3 }
  0x1b   : > { %p3079_p1 = pnand %p3409_p0, %p3077_p13 }
  0x1d   : > { %p3080_p2 = pneg %p3079_p1 }
  0x1f   : > { %p3085_p4 = pnand %p3083_p3, %p3080_p2 }
  0x21   : > { %3088 = shalt.err (!%p3085_p4)
}
  0x22   : > { %s3089_s29 = scalar_lea.vmem %s3389_s23, 1024  ;;  %p3097_p9 = scmp.lt.s32.totalorder %s3389_s23, %s3389_s23 }
  0x23   : > { %p3090_p7 = scmp.ne.s32.totalorder %s3389_s23, %s3089_s29  ;;  %p3098_p6 = scmp.lt.s32.totalorder %s3089_s29, %s3089_s29 }
  0x25   : > { %p3092_p8 = pnand %p3090_p7, %p3409_p0  ;;  %p3099_p13 = por %p3098_p6, %p3097_p9 }
  0x27   : > { %p3093_p11 = pneg %p3092_p8 }
  0x29   : > { %p3100_p1 = pnand %p3099_p13, %p3093_p11 }
  0x2b   : > { %3103 = shalt.err (!%p3100_p1)
}
  0x2c   : > { %s3267_s14 = smov 64   ;;  %s3268_s16 = smov 4  }
  0x2d   : > { %2828 = dma.hbm_to_vmem [thread:$0]  (!%p3393_p12), %s3663_s3, 1024, %s3389_s23, [#allocation6], %s3267_s14, %s3267_s14, %s3268_s16  }
  0x2e   : > { %s3104_s29 = scalar_lea.hbm %s3661_s1, 16384 }
  0x2f   : > { %p3105_p6 = scmp.ne.s32.totalorder %s3661_s1, %s3104_s29  ;;  %p3111_p3 = scmp.lt.u32.totalorder %s3104_s29, %s3661_s1 }
  0x31   : > { %p3107_p9 = pnand %p3105_p6, %p3409_p0 }
  0x33   : > { %p3108_p2 = pneg %p3107_p9 }
  0x35   : > { %p3113_p4 = pnand %p3111_p3, %p3108_p2 }
  0x37   : > { %3116 = shalt.err (!%p3113_p4)
}
  0x38   : > { %s3117_s23 = scalar_lea.vmem %s3397_s26, 16384  ;;  %p3125_p13 = scmp.lt.s32.totalorder %s3397_s26, %s3397_s26 }
  0x39   : > { %p3118_p7 = scmp.ne.s32.totalorder %s3397_s26, %s3117_s23  ;;  %p3126_p1 = scmp.lt.s32.totalorder %s3117_s23, %s3117_s23 }
  0x3b   : > { %p3120_p8 = pnand %p3118_p7, %p3409_p0  ;;  %p3127_p6 = por %p3126_p1, %p3125_p13 }
  0x3d   : > { %p3121_p11 = pneg %p3120_p8 }
  0x3f   : > { %p3128_p9 = pnand %p3127_p6, %p3121_p11 }
  0x41   : > { %3131 = shalt.err (!%p3128_p9)
}
  0x42   : > { %2825 = dma.hbm_to_vmem [thread:$0]  (!%p3393_p12), %s3661_s1, 16384, %s3397_s26, [#allocation3], %s3267_s14, %s3267_s14, %s3268_s16  }
  0x43   : > { %s3132_s17 = scalar_lea.hbm %s3665_s5, 1024 }
  0x44   : > { %p3133_p2 = scmp.ne.s32.totalorder %s3665_s5, %s3132_s17  ;;  %p3139_p7 = scmp.lt.u32.totalorder %s3132_s17, %s3665_s5 }
  0x46   : > { %p3135_p3 = pnand %p3133_p2, %p3409_p0 }
  0x48   : > { %p3136_p4 = pneg %p3135_p3 }
  0x4a   : > { %p3141_p8 = pnand %p3139_p7, %p3136_p4 }
  0x4c   : > { %3144 = shalt.err (!%p3141_p8)
}
  0x4d   : > { %s3145_s23 = scalar_lea.vmem %s295_s28, 1024  ;;  %p3153_p6 = scmp.lt.s32.totalorder %s295_s28, %s295_s28 }
  0x4e   : > { %p3146_p11 = scmp.ne.s32.totalorder %s295_s28, %s3145_s23  ;;  %p3154_p9 = scmp.lt.s32.totalorder %s3145_s23, %s3145_s23 }
  0x50   : > { %p3148_p13 = pnand %p3146_p11, %p3409_p0  ;;  %p3155_p5 = por %p3154_p9, %p3153_p6 }
  0x52   : > { %p3149_p1 = pneg %p3148_p13 }
  0x54   : > { %p3156_p10 = pnand %p3155_p5, %p3149_p1 }
  0x56   : > { %3159 = shalt.err (!%p3156_p10)
}
  0x57   : > { %2831 = dma.hbm_to_vmem [thread:$0]  (!%p3393_p12), %s3665_s5, 1024, %s295_s28, [#allocation6], %s3267_s14, %s3267_s14, %s3268_s16  }
  0x58   : > { %s3269_s11 = smov [#allocation8]   ;;  %s3160_s22 = scalar_lea.hbm %s3667_s7, 2048 }
  0x59   : > { %s310_s15 = sshll.u32 %s3269_s11, 4  ;;  %p3161_p5 = scmp.ne.s32.totalorder %s3667_s7, %s3160_s22  ;;  %s311_s15 = int_to_ptr.vmem [resolvable:$true] %s310_s15 }
  0x5a   : > { %p3167_p3 = scmp.lt.u32.totalorder %s3160_s22, %s3667_s7 }
  0x5b   : > { %p3163_p10 = pnand %p3161_p5, %p3409_p0 }
  0x5d   : > { %p3164_p2 = pneg %p3163_p10 }
  0x5f   : > { %p3169_p4 = pnand %p3167_p3, %p3164_p2 }
  0x61   : > { %3172 = shalt.err (!%p3169_p4)
}
  0x62   : > { %s3173_s28 = scalar_lea.vmem %s311_s15, 2048  ;;  %p3181_p13 = scmp.lt.s32.totalorder %s311_s15, %s311_s15 }
  0x63   : > { %p3174_p7 = scmp.ne.s32.totalorder %s311_s15, %s3173_s28  ;;  %p3182_p1 = scmp.lt.s32.totalorder %s3173_s28, %s3173_s28 }
  0x65   : > { %p3176_p8 = pnand %p3174_p7, %p3409_p0  ;;  %p3183_p6 = por %p3182_p1, %p3181_p13 }
  0x67   : > { %p3177_p11 = pneg %p3176_p8 }
  0x69   : > { %p3184_p9 = pnand %p3183_p6, %p3177_p11 }
  0x6b   : > { %3187 = shalt.err (!%p3184_p9)
}
  0x6c   : > { %s3270_s14 = smov 128   ;;  %s3271_s16 = smov 8  }
  0x6d   : > { %2834 = dma.hbm_to_vmem [thread:$0]  (!%p3393_p12), %s3667_s7, 2048, %s311_s15, [#allocation9], %s3270_s14, %s3270_s14, %s3271_s16  }
  0x6e   : > { %p3688_p5 = scmp.ne.s32.totalorder %s3685_s21, 0 }
  0x6f   : > { %p3689_p10 = scmp.eq.s32.totalorder (!%p3688_p5), %s3355_s13, 0 }
  0x70   : > { %336 = sbr.rel (%p3688_p5) target bundleno = 1255 (0x4e7), region = 56 }
  0x77   : > { %3233 = dma.done.wait (%p3689_p10), [#allocation3], 16384   ;;  %p3690_p0 = pmov %p3689_p10 }
  0x79   : > { %3235 = vsyncadd (%p3690_p0), [#allocation3], 4294950912  ;;  %p3691_p2 = pmov %p3690_p0 }
  0x7a   : > { %p3692_p3 = pmov %p3690_p0 }
  0x7b   : > { %3237 = dma.done.wait (%p3691_p2), [#allocation6], 2048  }
  0x7c   : > { %3239 = vsyncadd (%p3692_p3), [#allocation6], 4294965248  ;;  %p3693_p4 = pmov %p3690_p0 }
  0x7d   : > { %p3694_p12 = pmov %p3690_p0 }
  0x7e   : > { %3241 = dma.done.wait (%p3693_p4), [#allocation9], 2048  }
  0x7f   : > { %3243 = vsyncadd (%p3694_p12), [#allocation9], 4294965248  ;;  %p383_p7 = scmp.lt.s32.totalorder %s3355_s13, 1  ;;  %v3272_v0 = vmov 1   ;;  %v3273_v1 = vmov 2   ;;  %v2908_v3 = vld [vmem:[#allocation2 + $0xc0] sm:$0xff]   ;;  %v389_v43 = vlaneseq }
  0x80   : > { %2899 = vset.pattern.permute.xlu0 %v3272_v0  ;;  %2901 = vset.pattern.permute.xlu1 %v3273_v1  ;;  %v2909_v4 = vld [vmem:[#allocation2 + $0x80] sm:$0xff]   ;;  %v2910_v5 = vld [vmem:[#allocation2 + $0xc8] sm:$0xff]   ;;  %v3274_v7 = vmov 0   ;;  %v3275_v8 = vmov 3   ;;  %v2914_v11 = vld [vmem:[#allocation2 + $0xd0] sm:$0xff]   ;;  %v3276_v14 = vmov 4  }
  0x81   : > { %s384_s18 = scalar_select %p383_p7, %s3355_s13, 1  ;;  %2570 = vmatprep.subr.bf16.mxu0 %v2908_v3  ;;  %v2911_v6 = vld [vmem:[#allocation2 + $0x88] sm:$0xff]   ;;  %v2912_v9 = vld [vmem:[#allocation2 + $0x40] sm:$0xff]   ;;  %v2915_v12 = vld [vmem:[#allocation2 + $0x90] sm:$0xff]   ;;  %v3277_v15 = vmov 5   ;;  %v3278_v21 = vmov 6  }
  0x82   : > { %2571 = vmatpush3.bf16.msra.mxu0 %v2909_v4  ;;  %v2913_v10 = vld [vmem:[#allocation2] sm:$0xff]   ;;  %2592 = vmatprep.subr.bf16.mxu1 %v2912_v9  ;;  %v2916_v13 = vld [vmem:[#allocation2 + $0x48] sm:$0xff]   ;;  %v2918_v17 = vld [vmem:[#allocation2 + $0xd8] sm:$0xff]   ;;  %v3279_v26 = vmov 7   ;;  %v3520_v44 = vand.u32 127, %v389_v43  ;;  %s380_s23 = sand.u32 1, %s3254_s10  }
  0x83   : > { %s2352_s21 = sshll.u32 %s384_s18, 3  ;;  %2572 = vmatprep.subr.bf16.mxu0 %v2910_v5  ;;  %2593 = vmatpush3.bf16.msra.mxu1 %v2913_v10  ;;  %v2917_v16 = vld [vmem:[#allocation2 + $0x8] sm:$0xff]   ;;  %v2919_v18 = vld [vmem:[#allocation2 + $0x98] sm:$0xff]   ;;  %v2920_v19 = vld [vmem:[#allocation2 + $0x50] sm:$0xff]   ;;  %v3280_v50 = vmov 1.0|1.0  }
  0x84   : > { %s386_s15 = scalar_lea.vmem %s3660_s0, %s2352_s21  ;;  %2594 = vmatprep.subr.bf16.mxu1 %v2916_v13  ;;  %v2921_v20 = vld [vmem:[#allocation2 + $0x10] sm:$0xff]   ;;  %v2922_v22 = vld [vmem:[#allocation2 + $0xe0] sm:$0xff]   ;;  %v2924_v24 = vld [vmem:[#allocation2 + $0x58] sm:$0xff]   ;;  %v3523_v45 = vadd.s32 128, %v3520_v44  ;;  %s2351_s28 = sshll.u32 %s380_s23, 4 }
  0x85   : > { %v388_v2 = vld [vmem:[%s386_s15] sm:$0xff]  ;;  %v2923_v23 = vld [vmem:[#allocation2 + $0xa0] sm:$0xff]   ;;  %v2925_v25 = vld [vmem:[#allocation2 + $0x18] sm:$0xff]   ;;  %s2569_s26 = sshll.u32 %s3355_s13, 8  ;;  %s382_s30 = scalar_lea.vmem [#allocation10], %s2351_s28 }
  0x86   : > { %436 = vperm.xlu0 %2899, %v388_v2   ;;  %752 = vperm.xlu1 %2901, %v388_v2   ;;  %v2926_v27 = vld [vmem:[#allocation2 + $0xe8] sm:$0xff]   ;;  %v2928_v29 = vld [vmem:[#allocation2 + $0x60] sm:$0xff]   ;;  %v2930_v31 = vld [vmem:[#allocation2 + $0xf0] sm:$0xff]   ;;  %s2239_s18 = sshll.u32 %s382_s30, 4  ;;  %s3618_s11 = scalar_lea.hbm %s3669_s9, %s2569_s26  ;;  %s3620_s18 = int_to_ptr.vmem [resolvable:$true] %s2239_s18 }
  0x87   : > { %2573 = vmatpush3.bf16.msra.mxu0 %v2911_v6  ;;  %2595 = vmatpush3.bf16.msra.mxu1 %v2917_v16  ;;  %v2927_v28 = vld [vmem:[#allocation2 + $0xa8] sm:$0xff]   ;;  %v2929_v30 = vld [vmem:[#allocation2 + $0x20] sm:$0xff]   ;;  %v2931_v32 = vld [vmem:[#allocation2 + $0xb0] sm:$0xff]   ;;  %s2225_s13 = scalar_lea.sflag [#allocation4], %s380_s23  ;;  %s3188_s15 = scalar_lea.vmem %s3620_s18, 256 }
  0x88   : > { %2574 = vmatprep.subr.bf16.mxu0 %v2914_v11  ;;  %2596 = vmatprep.subr.bf16.mxu1 %v2920_v19  ;;  %v2932_v33 = vld [vmem:[#allocation2 + $0x68] sm:$0xff]   ;;  %v2934_v35 = vld [vmem:[#allocation2 + $0xf8] sm:$0xff]   ;;  %v2936_v37 = vld [vmem:[#allocation2 + $0x70] sm:$0xff]   ;;  %p3189_p8 = scmp.ne.s32.totalorder %s3620_s18, %s3188_s15  ;;  %p3695_p11 = scmp.ne.s32.totalorder %s3682_s19, 0 }
  0x89   : > { %v2933_v34 = vld [vmem:[#allocation2 + $0x28] sm:$0xff]   ;;  %v2935_v36 = vld [vmem:[#allocation2 + $0xb8] sm:$0xff]   ;;  %v2937_v38 = vld [vmem:[#allocation2 + $0x30] sm:$0xff]   ;;  %s3283_s20 = smov [#allocation10]  }
  0x8a   : > { %2900 = vset.pattern.permute.xlu0 %v3274_v7  ;;  %2902 = vset.pattern.permute.xlu1 %v3275_v8  ;;  %v2938_v39 = vld [vmem:[#allocation2 + $0x140] sm:$0xff]   ;;  %v2939_v40 = vld [vmem:[#allocation2 + $0x78] sm:$0xff]   ;;  %v2942_v49 = vld [vmem:[#allocation2 + $0x148] sm:$0xff]   ;;  %p3190_p13 = pnand %p3189_p8, %p3695_p11  ;;  %s3192_s17 = sshll.u32 %s3283_s20, 4  ;;  %s3193_s17 = int_to_ptr.vmem [resolvable:$false] %s3192_s17 }
  0x8b   : > { %393 = vperm.xlu0 %2900, %v388_v2   ;;  %933 = vperm.xlu1 %2902, %v388_v2   ;;  %v2941_v41 = vld [vmem:[#allocation2 + $0x38] sm:$0xff]   ;;  %v2944_v42 = vld [vmem:[#allocation2 + $0x1c0] sm:$0xff]   ;;  %v2943_v51 = vld [vmem:[#allocation2 + $0x108] sm:$0xff]   ;;  %s3194_s22 = scalar_lea.vmem %s3193_s17, 512  ;;  %p3195_p6 = scmp.lt.s32.totalorder %s3620_s18, %s3193_s17 }
  0x8c   : > { %2575 = vmatpush3.bf16.msra.mxu0 %v2915_v12  ;;  %2597 = vmatpush3.bf16.msra.mxu1 %v2921_v20  ;;  %v2940_v47 = vld [vmem:[#allocation2 + $0x100] sm:$0xff]   ;;  %v2946_v54 = vld [vmem:[#allocation2 + $0x150] sm:$0xff]   ;;  %v2948_v56 = vld [vmem:[#allocation2 + $0x1c8] sm:$0xff]   ;;  %p3191_p1 = pneg %p3190_p13  ;;  %p3196_p9 = scmp.lt.s32.totalorder %s3194_s22, %s3188_s15 }
  0x8d   : > { %2576 = vmatprep.subr.bf16.mxu0 %v2918_v17  ;;  %2598 = vmatprep.subr.bf16.mxu1 %v2924_v24  ;;  %v2945_v53 = vld [vmem:[#allocation2 + $0x180] sm:$0xff]   ;;  %v2947_v57 = vld [vmem:[#allocation2 + $0x110] sm:$0xff]   ;;  %v2949_v58 = vld [vmem:[#allocation2 + $0x188] sm:$0xff]  }
  0x8e   : > { %v2950_v59 = vld [vmem:[#allocation2 + $0x158] sm:$0xff]   ;;  %v2952_v61 = vld [vmem:[#allocation2 + $0x1d0] sm:$0xff]   ;;  %v2954_v63 = vld [vmem:[#allocation2 + $0x160] sm:$0xff]   ;;  %p3197_p5 = por %p3196_p9, %p3195_p6 }
  0x8f   : > { %2903 = vset.pattern.permute.xlu1 %v3276_v14  ;;  %2904 = vset.pattern.permute.xlu0 %v3277_v15  ;;  %v2951_v60 = vld [vmem:[#allocation2 + $0x118] sm:$0xff]   ;;  %v2953_v62 = vld [vmem:[#allocation2 + $0x190] sm:$0xff]   ;;  %v2955_v1 = vld [vmem:[#allocation2 + $0x120] sm:$0xff]  }
  0x90   : > { %1114 = vperm.xlu1 %2903, %v388_v2   ;;  %1295 = vperm.xlu0 %2904, %v388_v2   ;;  %v2956_v0 = vld [vmem:[#allocation2 + $0x1d8] sm:$0xff]   ;;  %v2958_v3 = vld [vmem:[#allocation2 + $0x168] sm:$0xff]   ;;  %v2960_v4 = vld [vmem:[#allocation2 + $0x1e0] sm:$0xff]   ;;  %p3198_p10 = pnand %p3197_p5, %p3191_p1 }
  0x91   : > { %2577 = vmatpush3.bf16.msra.mxu0 %v2919_v18  ;;  %2599 = vmatpush3.bf16.msra.mxu1 %v2925_v25  ;;  %v2959_v5 = vld [vmem:[#allocation2 + $0x128] sm:$0xff]   ;;  %v2961_v6 = vld [vmem:[#allocation2 + $0x1a0] sm:$0xff]   ;;  %v2962_v8 = vld [vmem:[#allocation2 + $0x170] sm:$0xff]  }
  0x92   : > { %2578 = vmatprep.subr.bf16.mxu0 %v2922_v22  ;;  %2600 = vmatprep.subr.bf16.mxu1 %v2928_v29  ;;  %v2964_v9 = vld [vmem:[#allocation2 + $0x1e8] sm:$0xff]   ;;  %v2963_v10 = vld [vmem:[#allocation2 + $0x130] sm:$0xff]   ;;  %v2966_v12 = vld [vmem:[#allocation2 + $0x178] sm:$0xff]  }
  0x93   : > { %v2965_v11 = vld [vmem:[#allocation2 + $0x1a8] sm:$0xff]   ;;  %v2968_v13 = vld [vmem:[#allocation2 + $0x1f0] sm:$0xff]   ;;  %v2967_v15 = vld [vmem:[#allocation2 + $0x138] sm:$0xff]  }
  0x94   : > { %2905 = vset.pattern.permute.xlu1 %v3278_v21  ;;  %2907 = vset.pattern.permute.xlu0 %v3279_v26  ;;  %v2969_v16 = vld [vmem:[#allocation2 + $0x1b0] sm:$0xff]   ;;  %v2970_v17 = vld [vmem:[#allocation2 + $0x240] sm:$0xff]   ;;  %v2971_v18 = vld [vmem:[#allocation2 + $0x1f8] sm:$0xff]  }
  0x95   : > { %1476 = vperm.xlu1 %2905, %v388_v2   ;;  %2579 = vmatpush3.bf16.msra.mxu0 %v2923_v23  ;;  %v2972_v19 = vld [vmem:[#allocation2 + $0x200] sm:$0xff]   ;;  %v2973_v20 = vld [vmem:[#allocation2 + $0x1b8] sm:$0xff]   ;;  %v2974_v21 = vld [vmem:[#allocation2 + $0x248] sm:$0xff]  }
  0x96   : > { %2580 = vmatprep.subr.bf16.mxu0 %v2926_v27  ;;  %2601 = vmatpush3.bf16.msra.mxu1 %v2929_v30  ;;  %v2976_v23 = vld [vmem:[#allocation2 + $0x2c0] sm:$0xff]   ;;  %v2975_v24 = vld [vmem:[#allocation2 + $0x208] sm:$0xff]   ;;  %v2982_v30 = vld [vmem:[#allocation2 + $0x258] sm:$0xff]  }
  0x97   : > { %2602 = vmatprep.subr.bf16.mxu1 %v2932_v33  ;;  %v2977_v25 = vld [vmem:[#allocation2 + $0x280] sm:$0xff]   ;;  %v2980_v27 = vld [vmem:[#allocation2 + $0x2c8] sm:$0xff]   ;;  %v2985_v33 = vld [vmem:[#allocation2 + $0x290] sm:$0xff]  }
  0x98   : > { %v2981_v29 = vld [vmem:[#allocation2 + $0x288] sm:$0xff]  }
  0x99   : > { %2906 = vset.pattern.permute.xlu1 %v3279_v26  ;;  %2581 = vmatpush3.bf16.msra.mxu0 %v2927_v28  ;;  %v2978_v26 = vld [vmem:[#allocation2 + $0x250] sm:$0xff]  }
  0x9a   : > { %1657 = vperm.xlu1 %2906, %v388_v2   ;;  %2582 = vmatprep.subr.bf16.mxu0 %v2930_v31  ;;  %v2957_v2 = vld [vmem:[#allocation2 + $0x198] sm:$0xff]   ;;  %v2979_v28 = vld [vmem:[#allocation2 + $0x210] sm:$0xff]  }
  0x9b   : > { %2603 = vmatpush3.bf16.msra.mxu1 %v2933_v34  ;;  %v2984_v31 = vld [vmem:[#allocation2 + $0x2d0] sm:$0xff]   ;;  %v2986_v34 = vld [vmem:[#allocation2 + $0x260] sm:$0xff]  }
  0x9c   : > { %2604 = vmatprep.subr.bf16.mxu1 %v2936_v37  ;;  %v2989_v37 = vld [vmem:[#allocation2 + $0x298] sm:$0xff]  }
  0x9d   : > { %2583 = vmatpush3.bf16.msra.mxu0 %v2931_v32  ;;  %v2983_v32 = vld [vmem:[#allocation2 + $0x218] sm:$0xff]  }
  0x9e   : > { %2584 = vmatprep.subr.bf16.mxu0 %v2934_v35  ;;  %v2988_v35 = vld [vmem:[#allocation2 + $0x2d8] sm:$0xff]  }
  0x9f   : > { %2605 = vmatpush3.bf16.msra.mxu1 %v2937_v38  ;;  %v2990_v38 = vld [vmem:[#allocation2 + $0x268] sm:$0xff]  }
  0xa0   : > { %2606 = vmatprep.subr.bf16.mxu1 %v2939_v40  ;;  %v2991_v40 = vld [vmem:[#allocation2 + $0x228] sm:$0xff]  }
  0xa1   : > { %2585 = vmatpush3.bf16.msra.mxu0 %v2935_v36  ;;  %v2987_v36 = vld [vmem:[#allocation2 + $0x220] sm:$0xff]  }
  0xa2   : > { %2614 = vmatprep.subr.bf16.mxu0 %v2938_v39  ;;  %v2992_v39 = vld [vmem:[#allocation2 + $0x2e0] sm:$0xff]  }
  0xa3   : > { %2607 = vmatpush3.bf16.msra.mxu1 %v2941_v41  ;;  %v2993_v41 = vld [vmem:[#allocation2 + $0x2a0] sm:$0xff]  }
  0xa4   : > { %2636 = vmatprep.subr.bf16.mxu1 %v2944_v42  ;;  %v2994_v42 = vld [vmem:[#allocation2 + $0x270] sm:$0xff]  }
 0x105   : > { %v437_v46 = vpop.permute.xlu0 %436  ;;  %v3525_v48 = vpop.permute.xlu1 %752 }
 0x106   : > { %vm438_vm0 = vcmp.eq.s32.totalorder %v437_v46, %v3520_v44  ;;  %vm439_vm1 = vcmp.eq.s32.totalorder %v437_v46, %v3523_v45  ;;  %vm755_vm2 = vcmp.eq.s32.totalorder %v3525_v48, %v3523_v45  ;;  %vm754_vm12 = vcmp.eq.s32.totalorder %v3525_v48, %v3520_v44  ;;  %v2996_v46 = vld [vmem:[#allocation2 + $0x2e8] sm:$0xff]  }
 0x107   : > { %vm2375_vm3 = vmpackc.low %vm438_vm0, %vm438_vm0  ;;  %v2997_v48 = vld [vmem:[#allocation2 + $0x2a8] sm:$0xff]  }
 0x108   : > { %vm2373_vm4 = vmpackc.low %vm439_vm1, %vm439_vm1 }
 0x109   : > { %2374 = vmatprep.mubr.msk.bf16.mxu0 %vm2373_vm4, %v3280_v50  ;;  %vm2415_vm5 = vmpackc.low %vm755_vm2, %vm755_vm2 }
 0x10a   : > { %2376 = vmatmul.mubr.msk.bf16.vlgmr.msra.gmra.mrb[0].mxu0 %vm2375_vm3, %v3280_v50  ;;  %v394_v52 = vpop.permute.xlu0 %393  ;;  %v3533_v55 = vpop.permute.xlu1 %933  ;;  %vm2417_vm14 = vmpackc.low %vm754_vm12, %vm754_vm12 }
 0x10b   : > { %2615 = vmatpush3.bf16.msra.mxu0 %v2940_v47  ;;  %vm395_vm6 = vcmp.eq.s32.totalorder %v394_v52, %v3520_v44  ;;  %vm396_vm7 = vcmp.eq.s32.totalorder %v394_v52, %v3523_v45  ;;  %2416 = vmatprep.mubr.msk.bf16.mxu0 %vm2415_vm5, %v3280_v50  ;;  %vm936_vm9 = vcmp.eq.s32.totalorder %v3533_v55, %v3523_v45  ;;  %v2995_v47 = vld [vmem:[#allocation2 + $0x230] sm:$0xff]  }
 0x10c   : > { %vm2395_vm8 = vmpackc.low %vm395_vm6, %vm395_vm6  ;;  %2616 = vmatprep.subr.bf16.mxu0 %v2942_v49  ;;  %vm935_vm0 = vcmp.eq.s32.totalorder %v3533_v55, %v3520_v44  ;;  %v2998_v49 = vld [vmem:[#allocation2 + $0x278] sm:$0xff]   ;;  %v3002_v55 = vld [vmem:[#allocation2 + $0x340] sm:$0xff]  }
 0x10d   : > { %vm2393_vm10 = vmpackc.low %vm396_vm7, %vm396_vm7 }
 0x10e   : > { %2394 = vmatprep.mubr.msk.bf16.mxu1 %vm2393_vm10, %v3280_v50  ;;  %vm2437_vm11 = vmpackc.low %vm936_vm9, %vm936_vm9 }
 0x10f   : > { %2617 = vmatpush3.bf16.msra.mxu0 %v2943_v51  ;;  %2396 = vmatmul.mubr.msk.bf16.vlgmr.msra.gmra.mrb[0].mxu1 %vm2395_vm8, %v3280_v50  ;;  %v3543_v14 = vpop.permute.xlu1 %1114  ;;  %v3549_v22 = vpop.permute.xlu0 %1295  ;;  %vm2439_vm2 = vmpackc.low %vm935_vm0, %vm935_vm0  ;;  %v3000_v51 = vld [vmem:[#allocation2 + $0x2f0] sm:$0xff]   ;;  %vm3282_vm0 = vmmov 0  }
 0x110   : > { %2637 = vmatpush3.bf16.msra.mxu1 %v2945_v53  ;;  %2618 = vmatprep.subr.bf16.mxu0 %v2946_v54  ;;  %vm1117_vm13 = vcmp.eq.s32.totalorder %v3543_v14, %v3523_v45  ;;  %vm1298_vm1 = vcmp.eq.s32.totalorder %v3549_v22, %v3523_v45  ;;  %v2999_v53 = vld [vmem:[#allocation2 + $0x238] sm:$0xff]   ;;  %vm1116_vm4 = vcmp.eq.s32.totalorder %v3543_v14, %v3520_v44  ;;  %v3001_v54 = vld [vmem:[#allocation2 + $0x2b0] sm:$0xff]   ;;  %v3023_v14 = vld [vmem:[#allocation2 + $0x328] sm:$0xff]  }
 0x111   : > { %2638 = vmatprep.subr.bf16.mxu1 %v2948_v56  ;;  %2438 = vmatprep.mubr.msk.bf16.mxu1 %vm2437_vm11, %v3280_v50  ;;  %vm2459_vm15 = vmpackc.low %vm1117_vm13, %vm1117_vm13  ;;  %v3003_v56 = vld [vmem:[#allocation2 + $0x2f8] sm:$0xff]   ;;  %vm1297_vm8 = vcmp.eq.s32.totalorder %v3549_v22, %v3520_v44 }
 0x112   : > { %vm2481_vm3 = vmpackc.low %vm1298_vm1, %vm1298_vm1  ;;  %v3031_v22 = vld [vmem:[#allocation2 + $0x338] sm:$0xff]  }
 0x113   : > { %2619 = vmatpush3.bf16.msra.mxu0 %v2947_v57  ;;  %vm2461_vm6 = vmpackc.low %vm1116_vm4, %vm1116_vm4  ;;  %v3004_v57 = vld [vmem:[#allocation2 + $0x300] sm:$0xff]  }
 0x114   : > { %2639 = vmatpush3.bf16.msra.mxu1 %v2949_v58  ;;  %2620 = vmatprep.subr.bf16.mxu0 %v2950_v59  ;;  %v3559_v52 = vpop.permute.xlu1 %1476  ;;  %v3005_v58 = vld [vmem:[#allocation2 + $0x2b8] sm:$0xff]   ;;  %v3006_v59 = vld [vmem:[#allocation2 + $0x348] sm:$0xff]   ;;  %vm2483_vm10 = vmpackc.low %vm1297_vm8, %vm1297_vm8 }
 0x115   : > { %2640 = vmatprep.subr.bf16.mxu1 %v2952_v61  ;;  %vm1479_vm5 = vcmp.eq.s32.totalorder %v3559_v52, %v3523_v45  ;;  %v3008_v61 = vld [vmem:[#allocation2 + $0x3c0] sm:$0xff]   ;;  %vm1478_vm12 = vcmp.eq.s32.totalorder %v3559_v52, %v3520_v44 }
 0x116   : > { %vm2503_vm7 = vmpackc.low %vm1479_vm5, %vm1479_vm5 }
 0x117   : > { %2621 = vmatpush3.bf16.msra.mxu0 %v2951_v60  ;;  %vm2505_vm13 = vmpackc.low %vm1478_vm12, %vm1478_vm12 }
 0x118   : > { %2641 = vmatpush3.bf16.msra.mxu1 %v2953_v62  ;;  %2622 = vmatprep.subr.bf16.mxu0 %v2954_v63  ;;  %v3007_v62 = vld [vmem:[#allocation2 + $0x308] sm:$0xff]   ;;  %v3009_v63 = vld [vmem:[#allocation2 + $0x380] sm:$0xff]  }
 0x119   : > { %2642 = vmatprep.subr.bf16.mxu1 %v2956_v0  ;;  %v3565_v60 = vpop.permute.xlu1 %1657  ;;  %v3010_v0 = vld [vmem:[#allocation2 + $0x350] sm:$0xff]  }
 0x11a   : > { %vm1660_vm9 = vcmp.eq.s32.totalorder %v3565_v60, %v3523_v45  ;;  %v3015_v45 = vld [vmem:[#allocation2 + $0x318] sm:$0xff]  }
 0x11b   : > { %2623 = vmatpush3.bf16.msra.mxu0 %v2955_v1  ;;  %v3012_v1 = vld [vmem:[#allocation2 + $0x3c8] sm:$0xff]   ;;  %vm2525_vm11 = vmpackc.low %vm1660_vm9, %vm1660_vm9 }
 0x11c   : > { %2643 = vmatpush3.bf16.msra.mxu1 %v2957_v2  ;;  %2624 = vmatprep.subr.bf16.mxu0 %v2958_v3  ;;  %v3011_v2 = vld [vmem:[#allocation2 + $0x310] sm:$0xff]   ;;  %v3013_v3 = vld [vmem:[#allocation2 + $0x388] sm:$0xff]  }
 0x11d   : > { %2644 = vmatprep.subr.bf16.mxu1 %v2960_v4  ;;  %v3014_v4 = vld [vmem:[#allocation2 + $0x358] sm:$0xff]  }
 0x11f   : > { %2625 = vmatpush3.bf16.msra.mxu0 %v2959_v5  ;;  %v3016_v5 = vld [vmem:[#allocation2 + $0x3d0] sm:$0xff]  }
 0x120   : > { %2645 = vmatpush3.bf16.msra.mxu1 %v2961_v6  ;;  %2626 = vmatprep.subr.bf16.mxu0 %v2962_v8  ;;  %v3017_v6 = vld [vmem:[#allocation2 + $0x390] sm:$0xff]   ;;  %v3018_v8 = vld [vmem:[#allocation2 + $0x360] sm:$0xff]  }
 0x121   : > { %2646 = vmatprep.subr.bf16.mxu1 %v2964_v9  ;;  %v3020_v9 = vld [vmem:[#allocation2 + $0x3d8] sm:$0xff]  }
 0x123   : > { %2627 = vmatpush3.bf16.msra.mxu0 %v2963_v10  ;;  %v3019_v10 = vld [vmem:[#allocation2 + $0x320] sm:$0xff]  }
 0x124   : > { %2647 = vmatpush3.bf16.msra.mxu1 %v2965_v11  ;;  %2628 = vmatprep.subr.bf16.mxu0 %v2966_v12  ;;  %v3021_v11 = vld [vmem:[#allocation2 + $0x398] sm:$0xff]   ;;  %v3022_v12 = vld [vmem:[#allocation2 + $0x368] sm:$0xff]  }
 0x125   : > { %2648 = vmatprep.subr.bf16.mxu1 %v2968_v13  ;;  %v3024_v13 = vld [vmem:[#allocation2 + $0x3e0] sm:$0xff]  }
 0x127   : > { %2629 = vmatpush3.bf16.msra.mxu0 %v2967_v15  ;;  %v3025_v15 = vld [vmem:[#allocation2 + $0x3a0] sm:$0xff]  }
 0x128   : > { %2649 = vmatpush3.bf16.msra.mxu1 %v2969_v16  ;;  %2658 = vmatprep.subr.bf16.mxu0 %v2970_v17  ;;  %v3026_v16 = vld [vmem:[#allocation2 + $0x370] sm:$0xff]   ;;  %v3028_v17 = vld [vmem:[#allocation2 + $0x3e8] sm:$0xff]  }
 0x129   : > { %2650 = vmatprep.subr.bf16.mxu1 %v2971_v18  ;;  %v3027_v18 = vld [vmem:[#allocation2 + $0x330] sm:$0xff]  }
 0x12a   : > { %2418 = vmatmul.mubr.msk.bf16.vlgmr.msra.gmra.mrb[4].mxu0 %vm2417_vm14, %v3280_v50  ;;  %vm1659_vm14 = vcmp.eq.s32.totalorder %v3565_v60, %v3520_v44  ;;  %v3039_v44 = vld [vmem:[#allocation5 + $0x18] sm:$0xff]  }
 0x12b   : > { %2659 = vmatpush3.bf16.msra.mxu0 %v2972_v19  ;;  %2460 = vmatprep.mubr.msk.bf16.mxu0 %vm2459_vm15, %v3280_v50  ;;  %v3029_v19 = vld [vmem:[#allocation2 + $0x3a8] sm:$0xff]   ;;  %vm2527_vm15 = vmpackc.low %vm1659_vm14, %vm1659_vm14 }
 0x12c   : > { %2651 = vmatpush3.bf16.msra.mxu1 %v2973_v20  ;;  %2660 = vmatprep.subr.bf16.mxu0 %v2974_v21  ;;  %v3030_v20 = vld [vmem:[#allocation2 + $0x378] sm:$0xff]   ;;  %v3032_v21 = vld [vmem:[#allocation2 + $0x3f0] sm:$0xff]  }
 0x12d   : > { %2680 = vmatprep.subr.bf16.mxu1 %v2976_v23  ;;  %v3033_v23 = vld [vmem:[#allocation2 + $0x3b0] sm:$0xff]  }
 0x12f   : > { %2440 = vmatmul.mubr.msk.bf16.vlgmr.msra.gmra.mrb[4].mxu1 %vm2439_vm2, %v3280_v50  ;;  %2661 = vmatpush3.bf16.msra.mxu0 %v2975_v24  ;;  %v3034_v24 = vld [vmem:[#allocation2 + $0x3f8] sm:$0xff]  }
 0x130   : > { %2681 = vmatpush3.bf16.msra.mxu1 %v2977_v25  ;;  %2662 = vmatprep.subr.bf16.mxu0 %v2978_v26  ;;  %v3035_v25 = vld [vmem:[#allocation2 + $0x3b8] sm:$0xff]   ;;  %v3036_v26 = vld [vmem:[#allocation5] sm:$0xff]  }
 0x131   : > { %2682 = vmatprep.subr.bf16.mxu1 %v2980_v27  ;;  %2482 = vmatprep.mubr.msk.bf16.mxu1 %vm2481_vm3, %v3280_v50  ;;  %v3281_v27 = vmov 0.0  }
 0x133   : > { %2663 = vmatpush3.bf16.msra.mxu0 %v2979_v28  ;;  %v3037_v28 = vld [vmem:[#allocation5 + $0x8] sm:$0xff]  }
 0x134   : > { %2683 = vmatpush3.bf16.msra.mxu1 %v2981_v29  ;;  %2664 = vmatprep.subr.bf16.mxu0 %v2982_v30  ;;  %v3038_v29 = vld [vmem:[#allocation5 + $0x10] sm:$0xff]   ;;  %v3041_v30 = vld [vmem:[#allocation5 + $0x28] sm:$0xff]  }
 0x135   : > { %2684 = vmatprep.subr.bf16.mxu1 %v2984_v31  ;;  %v3042_v31 = vld [vmem:[#allocation5 + $0x30] sm:$0xff]  }
 0x137   : > { %2665 = vmatpush3.bf16.msra.mxu0 %v2983_v32  ;;  %v3043_v32 = vld [vmem:[#allocation5 + $0x38] sm:$0xff]  }
 0x138   : > { %2685 = vmatpush3.bf16.msra.mxu1 %v2985_v33  ;;  %2666 = vmatprep.subr.bf16.mxu0 %v2986_v34  ;;  %v3044_v33 = vld [vmem:[#allocation7] sm:$0xff]   ;;  %v3045_v34 = vld [vmem:[#allocation7 + $0x8] sm:$0xff]  }
 0x139   : > { %2686 = vmatprep.subr.bf16.mxu1 %v2988_v35  ;;  %v3046_v35 = vld [vmem:[#allocation7 + $0x10] sm:$0xff]  }
 0x13b   : > { %2667 = vmatpush3.bf16.msra.mxu0 %v2987_v36  ;;  %v3047_v36 = vld [vmem:[#allocation7 + $0x18] sm:$0xff]  }
 0x13c   : > { %2687 = vmatpush3.bf16.msra.mxu1 %v2989_v37  ;;  %2668 = vmatprep.subr.bf16.mxu0 %v2990_v38  ;;  %v3048_v37 = vld [vmem:[#allocation7 + $0x20] sm:$0xff]  }
 0x13d   : > { %2688 = vmatprep.subr.bf16.mxu1 %v2992_v39 }
 0x13f   : > { %2669 = vmatpush3.bf16.msra.mxu0 %v2991_v40 }
 0x140   : > { %2689 = vmatpush3.bf16.msra.mxu1 %v2993_v41  ;;  %2670 = vmatprep.subr.bf16.mxu0 %v2994_v42 }
 0x141   : > { %2690 = vmatprep.subr.bf16.mxu1 %v2996_v46  ;;  %v3049_v46 = vld [vmem:[#allocation7 + $0x28] sm:$0xff]  }
 0x143   : > { %2671 = vmatpush3.bf16.msra.mxu0 %v2995_v47 }
 0x144   : > { %2691 = vmatpush3.bf16.msra.mxu1 %v2997_v48  ;;  %2672 = vmatprep.subr.bf16.mxu0 %v2998_v49 }
 0x145   : > { %2692 = vmatprep.subr.bf16.mxu1 %v3000_v51 }
 0x147   : > { %2673 = vmatpush3.bf16.msra.mxu0 %v2999_v53 }
 0x148   : > { %2693 = vmatpush3.bf16.msra.mxu1 %v3001_v54  ;;  %2702 = vmatprep.subr.bf16.mxu0 %v3002_v55 }
 0x149   : > { %2694 = vmatprep.subr.bf16.mxu1 %v3003_v56 }
 0x14a   : > { %2462 = vmatmul.mubr.msk.bf16.vlgmr.msra.gmra.mrb[8].mxu0 %vm2461_vm6, %v3280_v50 }
 0x14b   : > { %2703 = vmatpush3.bf16.msra.mxu0 %v3004_v57  ;;  %2504 = vmatprep.mubr.msk.bf16.mxu0 %vm2503_vm7, %v3280_v50 }
 0x14c   : > { %2695 = vmatpush3.bf16.msra.mxu1 %v3005_v58  ;;  %2704 = vmatprep.subr.bf16.mxu0 %v3006_v59 }
 0x14d   : > { %2724 = vmatprep.subr.bf16.mxu1 %v3008_v61 }
 0x14f   : > { %2484 = vmatmul.mubr.msk.bf16.vlgmr.msra.gmra.mrb[8].mxu1 %vm2483_vm10, %v3280_v50  ;;  %2705 = vmatpush3.bf16.msra.mxu0 %v3007_v62 }
 0x150   : > { %2725 = vmatpush3.bf16.msra.mxu1 %v3009_v63  ;;  %2706 = vmatprep.subr.bf16.mxu0 %v3010_v0 }
 0x151   : > { %2726 = vmatprep.subr.bf16.mxu1 %v3012_v1  ;;  %2526 = vmatprep.mubr.msk.bf16.mxu1 %vm2525_vm11, %v3280_v50 }
 0x153   : > { %2707 = vmatpush3.bf16.msra.mxu0 %v3011_v2 }
 0x154   : > { %2727 = vmatpush3.bf16.msra.mxu1 %v3013_v3  ;;  %2708 = vmatprep.subr.bf16.mxu0 %v3014_v4 }
 0x155   : > { %2728 = vmatprep.subr.bf16.mxu1 %v3016_v5 }
 0x157   : > { %2709 = vmatpush3.bf16.msra.mxu0 %v3015_v45 }
 0x158   : > { %2729 = vmatpush3.bf16.msra.mxu1 %v3017_v6  ;;  %2710 = vmatprep.subr.bf16.mxu0 %v3018_v8 }
 0x159   : > { %2730 = vmatprep.subr.bf16.mxu1 %v3020_v9 }
 0x15b   : > { %2711 = vmatpush3.bf16.msra.mxu0 %v3019_v10 }
 0x15c   : > { %2731 = vmatpush3.bf16.msra.mxu1 %v3021_v11  ;;  %2712 = vmatprep.subr.bf16.mxu0 %v3022_v12 }
 0x15d   : > { %2732 = vmatprep.subr.bf16.mxu1 %v3024_v13 }
 0x15f   : > { %2713 = vmatpush3.bf16.msra.mxu0 %v3023_v14 }
 0x160   : > { %2733 = vmatpush3.bf16.msra.mxu1 %v3025_v15  ;;  %2714 = vmatprep.subr.bf16.mxu0 %v3026_v16 }
 0x161   : > { %2734 = vmatprep.subr.bf16.mxu1 %v3028_v17 }
 0x163   : > { %2715 = vmatpush3.bf16.msra.mxu0 %v3027_v18 }
 0x164   : > { %2735 = vmatpush3.bf16.msra.mxu1 %v3029_v19  ;;  %2716 = vmatprep.subr.bf16.mxu0 %v3030_v20 }
 0x165   : > { %2736 = vmatprep.subr.bf16.mxu1 %v3032_v21 }
 0x167   : > { %2717 = vmatpush3.bf16.msra.mxu0 %v3031_v22 }
 0x168   : > { %2737 = vmatpush3.bf16.msra.mxu1 %v3033_v23  ;;  %2764 = vmatprep.subr.bf16.mxu0 %v3281_v27 }
 0x169   : > { %2738 = vmatprep.subr.bf16.mxu1 %v3034_v24  ;;  %v2529_v24 = vld [vmem:[%s3662_s2] ss:$0 sm:$0xff] }
 0x16a   : > { %2506 = vmatmul.mubr.msk.bf16.vlgmr.msra.gmra.mrb[12].mxu0 %vm2505_vm13, %v3280_v50 }
 0x16b   : > { %2765 = vmatpush3.bf16.msra.mxu0 %v3036_v26  ;;  %2780 = vmatprep.mubr.msk.bf16.mxu0 %vm3282_vm0, %v3281_v27 }
 0x16c   : > { %2739 = vmatpush3.bf16.msra.mxu1 %v3035_v25  ;;  %2766 = vmatprep.subr.bf16.mxu0 %v3281_v27 }
 0x16d   : > { %2784 = vmatprep.subr.bf16.mxu1 %v3281_v27 }
 0x16f   : > { %2528 = vmatmul.mubr.msk.bf16.vlgmr.msra.gmra.mrb[12].mxu1 %vm2527_vm15, %v3280_v50  ;;  %2767 = vmatpush3.bf16.msra.mxu0 %v3037_v28  ;;  %v3040_v50 = vld [vmem:[#allocation5 + $0x20] sm:$0xff]  }
 0x170   : > { %2768 = vmatprep.subr.bf16.mxu0 %v3281_v27  ;;  %2800 = vmatprep.mubr.msk.bf16.mxu1 %vm3282_vm0, %v3281_v27 }
 0x171   : > { %2785 = vmatpush3.bf16.msra.mxu1 %v3044_v33  ;;  %v3057_v33 = vld [vmem:[#allocation8 + $0x14] ss:$8 sps:$4 sm:$0xff]  }
 0x172   : > { %2786 = vmatprep.subr.bf16.mxu1 %v3281_v27 }
 0x173   : > { %2769 = vmatpush3.bf16.msra.mxu0 %v3038_v29 }
 0x174   : > { %2770 = vmatprep.subr.bf16.mxu0 %v3281_v27 }
 0x175   : > { %2787 = vmatpush3.bf16.msra.mxu1 %v3045_v34  ;;  %v3055_v34 = vld [vmem:[#allocation8 + $0x10] ss:$8 sps:$4 sm:$0xff]  }
 0x176   : > { %2788 = vmatprep.subr.bf16.mxu1 %v3281_v27 }
 0x177   : > { %2771 = vmatpush3.bf16.msra.mxu0 %v3039_v44 }
 0x178   : > { %2772 = vmatprep.subr.bf16.mxu0 %v3281_v27 }
 0x179   : > { %2789 = vmatpush3.bf16.msra.mxu1 %v3046_v35  ;;  %v3060_v35 = vld [vmem:[#allocation8 + $0x24] ss:$8 sps:$4 sm:$0xff]  }
 0x17a   : > { %2790 = vmatprep.subr.bf16.mxu1 %v3281_v27 }
 0x17b   : > { %2773 = vmatpush3.bf16.msra.mxu0 %v3040_v50  ;;  %v3050_v50 = vld [vmem:[#allocation7 + $0x30] sm:$0xff]  }
 0x17c   : > { %2774 = vmatprep.subr.bf16.mxu0 %v3281_v27 }
 0x17d   : > { %2791 = vmatpush3.bf16.msra.mxu1 %v3047_v36  ;;  %v3058_v36 = vld [vmem:[#allocation8 + $0x20] ss:$8 sps:$4 sm:$0xff]  }
 0x17e   : > { %2792 = vmatprep.subr.bf16.mxu1 %v3281_v27 }
 0x17f   : > { %2775 = vmatpush3.bf16.msra.mxu0 %v3041_v30  ;;  %v3051_v30 = vld [vmem:[#allocation7 + $0x38] sm:$0xff]  }
 0x180   : > { %2776 = vmatprep.subr.bf16.mxu0 %v3281_v27 }
 0x181   : > { %2793 = vmatpush3.bf16.msra.mxu1 %v3048_v37  ;;  %v3063_v37 = vld [vmem:[#allocation8 + $0x34] ss:$8 sps:$4 sm:$0xff]  }
 0x182   : > { %2794 = vmatprep.subr.bf16.mxu1 %v3281_v27 }
 0x183   : > { %2777 = vmatpush3.bf16.msra.mxu0 %v3042_v31  ;;  %v3052_v31 = vld [vmem:[#allocation8] ss:$8 sps:$4 sm:$0xff]  }
 0x184   : > { %2778 = vmatprep.subr.bf16.mxu0 %v3281_v27 }
 0x185   : > { %2795 = vmatpush3.bf16.msra.mxu1 %v3049_v46  ;;  %v2530_v46 = vld [vmem:[%s3664_s4] ss:$0 sm:$0xff] }
 0x186   : > { %2796 = vmatprep.subr.bf16.mxu1 %v3281_v27 }
 0x187   : > { %2779 = vmatpush3.bf16.msra.mxu0 %v3043_v32  ;;  %v3054_v32 = vld [vmem:[#allocation8 + $0x4] ss:$8 sps:$4 sm:$0xff]  }
 0x188   : > { %2181 = vmatprep.subr.bf16.mxu0 %v3054_v32 }
 0x189   : > { %2797 = vmatpush3.bf16.msra.mxu1 %v3050_v50 }
 0x18a   : > { %2798 = vmatprep.subr.bf16.mxu1 %v3281_v27  ;;  %v3064_v27 = vld [vmem:[#allocation8 + $0x40] ss:$8 sps:$4 sm:$0xff]  }
 0x18d   : > { %2799 = vmatpush3.bf16.msra.mxu1 %v3051_v30 }
 0x1dd   : > { %v2586_v38 = vpop.f32.mrb[0].mxu0 }
 0x1de   : > { %v2587_v39 = vpop.f32.mrb[1].mxu0 }
 0x1df   : > { %v2588_v40 = vadd.f32 %v2587_v39, %v2586_v38  ;;  %v2589_v41 = vpop.f32.mrb[2].mxu0  ;;  %v3066_v38 = vld [vmem:[#allocation8 + $0x44] ss:$8 sps:$4 sm:$0xff]   ;;  %v3069_v39 = vld [vmem:[#allocation8 + $0x54] ss:$8 sps:$4 sm:$0xff]  }
 0x1e0   : > { %v2590_v42 = vpop.f32.mrb[3].mxu0  ;;  %v3072_v41 = vld [vmem:[#allocation8 + $0x64] ss:$8 sps:$4 sm:$0xff]  }
 0x1e1   : > { %v3070_v42 = vld [vmem:[#allocation8 + $0x60] ss:$8 sps:$4 sm:$0xff]  }
 0x1e2   : > { %v2608_v47 = vpop.f32.mrb[0].mxu1 }
 0x1e3   : > { %v2609_v48 = vpop.f32.mrb[1].mxu1 }
 0x1e4   : > { %v2610_v49 = vadd.f32 %v2609_v48, %v2608_v47  ;;  %v2611_v51 = vpop.f32.mrb[2].mxu1 }
 0x1e5   : > { %v2612_v52 = vpop.f32.mrb[3].mxu1 }
 0x1e6   : > { %v746_v53 = vadd.f32 %v2610_v49, %v2588_v40  ;;  %v3067_v40 = vld [vmem:[#allocation8 + $0x50] ss:$8 sps:$4 sm:$0xff]  }
 0x1fd   : > { %v2630_v54 = vpop.f32.mrb[4].mxu0 }
 0x1fe   : > { %v2631_v55 = vpop.f32.mrb[5].mxu0 }
 0x1ff   : > { %v2632_v56 = vadd.f32 %v2631_v55, %v2630_v54  ;;  %v2633_v57 = vpop.f32.mrb[6].mxu0  ;;  %v3075_v55 = vld [vmem:[#allocation8 + $0x74] ss:$8 sps:$4 sm:$0xff]  }
 0x200   : > { %v2634_v58 = vpop.f32.mrb[7].mxu0  ;;  %v2539_v57 = vld [vmem:[%s3666_s6] ss:$0 sm:$0xff] }
 0x201   : > { %v931_v59 = vadd.f32 %v2632_v56, %v746_v53  ;;  %v3073_v56 = vld [vmem:[#allocation8 + $0x70] ss:$8 sps:$4 sm:$0xff]  }
 0x202   : > { %v2652_v60 = vpop.f32.mrb[4].mxu1 }
 0x203   : > { %v2653_v61 = vpop.f32.mrb[5].mxu1 }
 0x204   : > { %v2654_v62 = vadd.f32 %v2653_v61, %v2652_v60  ;;  %v2655_v63 = vpop.f32.mrb[6].mxu1 }
 0x205   : > { %v2656_v0 = vpop.f32.mrb[7].mxu1 }
 0x206   : > { %v1112_v1 = vadd.f32 %v2654_v62, %v931_v59 }
 0x21d   : > { %v2674_v2 = vpop.f32.mrb[8].mxu0 }
 0x21e   : > { %v2675_v3 = vpop.f32.mrb[9].mxu0 }
 0x21f   : > { %v2676_v4 = vadd.f32 %v2675_v3, %v2674_v2  ;;  %v2677_v5 = vpop.f32.mrb[10].mxu0  ;;  %v2089_v3 = vld [vmem:[%s3668_s8] sm:$0x3] }
 0x220   : > { %v2678_v45 = vpop.f32.mrb[11].mxu0 }
 0x221   : > { %v1293_v6 = vadd.f32 %v2676_v4, %v1112_v1  ;;  %v2092_v1 = vshrl.u32 %v389_v43, 7 }
 0x222   : > { %v2696_v8 = vpop.f32.mrb[8].mxu1 }
 0x223   : > { %v2697_v9 = vpop.f32.mrb[9].mxu1  ;;  %v2093_v2 = vsub.s32 0, %v2092_v1  ;;  %v2097_v4 = vsub.s32 1, %v2092_v1 }
 0x224   : > { %v2698_v10 = vadd.f32 %v2697_v9, %v2696_v8  ;;  %v2699_v11 = vpop.f32.mrb[10].mxu1 }
 0x225   : > { %v2700_v12 = vpop.f32.mrb[11].mxu1  ;;  %v2094_v5 = vrot.slane %v2089_v3, %v2093_v2  ;;  %v2098_v45 = vrot.slane %v2089_v3, %v2097_v4 }
 0x226   : > { %v1474_v13 = vadd.f32 %v2698_v10, %v1293_v6 }
 0x23d   : > { %v2718_v14 = vpop.f32.mrb[12].mxu0 }
 0x23e   : > { %v2719_v15 = vpop.f32.mrb[13].mxu0 }
 0x23f   : > { %v2720_v16 = vadd.f32 %v2719_v15, %v2718_v14  ;;  %v2721_v17 = vpop.f32.mrb[14].mxu0 }
 0x240   : > { %v2722_v18 = vpop.f32.mrb[15].mxu0 }
 0x241   : > { %v1655_v19 = vadd.f32 %v2720_v16, %v1474_v13 }
 0x242   : > { %v2740_v20 = vpop.f32.mrb[12].mxu1 }
 0x243   : > { %v2741_v21 = vpop.f32.mrb[13].mxu1 }
 0x244   : > { %v2742_v22 = vadd.f32 %v2741_v21, %v2740_v20  ;;  %v2743_v23 = vpop.f32.mrb[14].mxu1 }
 0x245   : > { %v2744_v25 = vpop.f32.mrb[15].mxu1 }
 0x246   : > { %v1836_v26 = vadd.f32 %v2742_v22, %v1655_v19 }
 0x248   : > { %v1844_v28 = vadd.f32 %v2529_v24, %v1836_v26 }
 0x24a   : > { %v1845_v29 = vmax.f32 %v1844_v28, 0.0 }
 0x24c   : > { %v1846_v44 = vpack.c.bf16 %v1845_v29, %v1845_v29 }
 0x24e   : > { %2781 = vmatmul.mubr.bf16.vlgmr.msra.gmra.mrb[16].mxu0 %v1846_v44 }
 0x24f   : > { %2213 = vmatprep.mubr.bf16.mxu0 %v3274_v7  ;;  %2182 = vmatpush1.bf16.msra.mxu0 %v3052_v31  ;;  %v3061_v7 = vld [vmem:[#allocation8 + $0x30] ss:$8 sps:$4 sm:$0xff]  }
 0x250   : > { %2183 = vmatprep.subr.bf16.mxu0 %v3057_v33 }
 0x253   : > { %2184 = vmatpush1.bf16.msra.mxu0 %v3055_v34 }
 0x254   : > { %2185 = vmatprep.subr.bf16.mxu0 %v3060_v35 }
 0x257   : > { %2186 = vmatpush1.bf16.msra.mxu0 %v3058_v36 }
 0x258   : > { %2187 = vmatprep.subr.bf16.mxu0 %v3063_v37 }
 0x25b   : > { %2188 = vmatpush1.bf16.msra.mxu0 %v3061_v7 }
 0x25c   : > { %2189 = vmatprep.subr.bf16.mxu0 %v3066_v38 }
 0x25f   : > { %2190 = vmatpush1.bf16.msra.mxu0 %v3064_v27 }
 0x260   : > { %2191 = vmatprep.subr.bf16.mxu0 %v3069_v39 }
 0x263   : > { %2192 = vmatpush1.bf16.msra.mxu0 %v3067_v40 }
 0x264   : > { %2193 = vmatprep.subr.bf16.mxu0 %v3072_v41 }
 0x267   : > { %2194 = vmatpush1.bf16.msra.mxu0 %v3070_v42 }
 0x268   : > { %2195 = vmatprep.subr.bf16.mxu0 %v3075_v55 }
 0x26b   : > { %2196 = vmatpush1.bf16.msra.mxu0 %v3073_v56 }
 0x321   : > { %v1952_v47 = vpop.f32.mrb[16].mxu0 }
 0x322   : > { %v1953_v48 = vadd.f32 %v2530_v46, %v1952_v47  ;;  %v2782_v49 = vpop.f32.mrb[17].mxu0 }
 0x323   : > { %v1955_v51 = vpop.f32.mrb[18].mxu0 }
 0x324   : > { %v1958_v52 = vmax.f32 %v1953_v48, 0.0  ;;  %v2783_v53 = vpop.f32.mrb[19].mxu0 }
 0x326   : > { %v1959_v54 = vpack.c.bf16 %v1958_v52, %v1958_v52 }
 0x328   : > { %2801 = vmatmul.mubr.bf16.vlgmr.msra.gmra.mrb[16].mxu1 %v1959_v54 }
 0x3fb   : > { %v2065_v58 = vpop.f32.mrb[16].mxu1 }
 0x3fc   : > { %v2066_v59 = vadd.f32 %v2539_v57, %v2065_v58  ;;  %v2802_v60 = vpop.f32.mrb[17].mxu1 }
 0x3fd   : > { %v2068_v61 = vpop.f32.mrb[18].mxu1 }
 0x3fe   : > { %v2071_v62 = vmax.f32 %v2066_v59, 0.0  ;;  %v2803_v63 = vpop.f32.mrb[19].mxu1 }
 0x400   : > { %v2072_v0 = vpack.c.bf16 %v2071_v62, %v2071_v62 }
 0x402   : > { %2214 = vmatmul.mubr.bf16.vlgmr.msra.gmra.mrb[20].mxu0 %v2072_v0 }
 0x4d5   : > { %v2215_v6 = vpop.f32.mrb[20].mxu0 }
 0x4d6   : > { %v2216_v8 = vadd.f32 %v2215_v6, %v2094_v5  ;;  %v2217_v9 = vpop.f32.mrb[21].mxu0 }
 0x4d7   : > { %v2218_v10 = vadd.f32 %v2217_v9, %v2098_v45  ;;  %v2219_v11 = vpop.f32.mrb[22].mxu0 }
 0x4d8   : > { %2222 = vst [vmem:[%s382_s30] sm:$0xff] %v2216_v8  ;;  %v2220_v43 = vpop.f32.mrb[23].mxu0 }
 0x4d9   : > { %2223 = vst [vmem:[%s382_s30 + $0x8] sm:$0xff] %v2218_v10 }
 0x4da   : > { %3201 = shalt.err (!%p3198_p10)
}
 0x4db   : > { %s3202_s25 = scalar_lea.hbm %s3618_s11, 256  ;;  %s3206_s23 = scalar_lea.hbm %s3669_s9, 512 }
 0x4dc   : > { %p3203_p0 = scmp.ne.s32.totalorder %s3618_s11, %s3202_s25  ;;  %p3207_p4 = scmp.lt.u32.totalorder %s3618_s11, %s3669_s9 }
 0x4dd   : > { %p3208_p12 = scmp.lt.u32.totalorder %s3206_s23, %s3202_s25  ;;  %p3210_p8 = scmp.lt.u32.totalorder %s3202_s25, %s3618_s11 }
 0x4de   : > { %p3204_p2 = pnand %p3203_p0, %p3695_p11 }
 0x4df   : > { %p3209_p7 = por %p3208_p12, %p3207_p4 }
 0x4e0   : > { %p3205_p3 = pneg %p3204_p2 }
 0x4e1   : > { %p3211_p13 = por %p3210_p8, %p3209_p7 }
 0x4e3   : > { %p3212_p1 = pnand %p3211_p13, %p3205_p3 }
 0x4e5   : > { %3215 = shalt.err (!%p3212_p1)
}
 0x4e6   : > { %2820 = dma.vmem_to_hbm [thread:$0]  (%p3695_p11), %s3620_s18, 256, %s3618_s11, %s2225_s13  }
 0x4e7 PF: > { %s3696_s16 = sld [smem:[#allocation15_spill]]  ;;  %s3697_s26 = sld [smem:[#allocation19_spill]] }
 0x4e8   : > { %p2847_p6 = scmp.ge.s32.totalorder %s3262_s12, 2 }
 0x4ed   : > { %s2251_s30 = sand.u32 1, %s3696_s16   ;;  %p3698_p9 = scmp.ne.s32.totalorder %s3697_s26, 0 }
 0x4ee   : > { %s2252_s21 = scalar_lea.sflag [#allocation4], %s2251_s30 }
 0x4ef   : > { %p2836_p5 = pnand %p2847_p6, %p3698_p9 }
 0x4f1   : > { %3245 = dma.done.wait (!%p2836_p5), %s2252_s21, 256  }
 0x4f2   : > { %3247 = vsyncadd (!%p2836_p5), %s2252_s21, 4294967040  ;;  %s3699_s12 = sld [smem:[#allocation17_spill]]  ;;  %s3700_s24 = sld [smem:[#allocation16_spill]] }
 0x4f3   : > { %s3701_s11 = sld [smem:[#allocation18_spill]]  ;;  %s3702_s30 = smov %s3254_s10 }
 0x4f8   : > { %p22_p10 = scmp.ge.s32.totalorder %s3699_s12, 4   ;;  %s3703_s10 = smov %s3700_s24 }
 0x4fa   :  { %24 = sbr.rel (!%p22_p10) target bundleno = 6 (0x6), region = 115 }
 0x501   :  { %2257 = vsyncpa [#allocation3], 1 }
 0x502   :  { %2259 = vsyncpa [#allocation3 + $0x1], 1 }
 0x503   :  { %2260 = vsyncpa [#allocation6], 1 }
 0x504   :  { %2261 = vsyncpa [#allocation9], 1 }
 0x505   :  { %2262 = vsyncpa [#allocation4], 1 }
 0x506   :  { %2264 = vsyncpa [#allocation4 + $0x1], 1 }

</bundles_post_ra>
